<compile_context>
chip_gen: v7x
topology: tpu7x:2x2x1
jax: 0.10.0
libtpu: 0.0.40
codegen_flags: <defaults>
</compile_context>

<pallas_src>
import functools

import jax
import jax.numpy as jnp
from jax import lax
from jax.experimental import pallas as pl
from jax.experimental.pallas import tpu as pltpu


def transforma1d_kernel(params_ref, x_ref, o_ref, *, bf16_tanh=False):
    # params_ref : SMEM (3H+1,) f32 = [w1 (H), b1 (H), w2 (H), b2]
    # x_ref      : VMEM (tile_rows, cols) f32   (lane-dense tile)
    # o_ref      : VMEM (tile_rows, cols) f32
    H = (params_ref.shape[0] - 1) // 3
    tile_rows, cols = x_ref.shape
    CH = 8                                   # (8, cols) f32 chunk stays in vregs

    # Hoist the 3H+1 SMEM scalar reads out of the chunk loop (loop-invariant).
    w1 = [params_ref[k] for k in range(H)]
    b1 = [params_ref[H + k] for k in range(H)]
    w2 = [params_ref[2 * H + k] for k in range(H)]
    b2 = params_ref[3 * H]

    def term(k, x):
        pre = w1[k] * x + b1[k]              # VPU mul/add
        if bf16_tanh:
            t = jnp.tanh(pre.astype(jnp.bfloat16)).astype(jnp.float32)  # EUP bf16
        else:
            t = jnp.tanh(pre)                # EUP f32
        return w2[k] * t                     # VPU mul

    def chunk(c, carry):
        r = pl.multiple_of(c * CH, CH)
        x = x_ref[pl.ds(r, CH), :]
        if H >= 2:
            # Two partial accumulators break the serial add chain; b2 is folded
            # into the first term (no zeros/broadcast init pass).
            acc0 = term(0, x) + b2
            acc1 = term(1, x)
            for k in range(2, H, 2):
                acc0 = acc0 + term(k, x)
            for k in range(3, H, 2):
                acc1 = acc1 + term(k, x)
            out = acc0 + acc1
        else:
            out = term(0, x) + b2
        o_ref[pl.ds(r, CH), :] = out
        return carry

    n_chunks = tile_rows // CH
    lax.fori_loop(0, n_chunks, chunk, 0,
                  unroll=(n_chunks if n_chunks <= 4 else 2))


def transforma1d(x, w1_t, b1_t, w2_t, b2_t, *, cols=512, tile_rows=1024,
                 use_pallas=None, small_n_threshold=1 << 20, bf16_tanh=False):
    """x: (B, E) float32.  Weights in PyTorch layout:
       w1_t (H, 1), b1_t (H,), w2_t (1, H), b2_t (1,)."""
    B, E = x.shape
    N = B * E
    x = x.astype(jnp.float32)
    w1 = w1_t.reshape(-1).astype(jnp.float32)
    b1 = b1_t.reshape(-1).astype(jnp.float32)
    w2 = w2_t.reshape(-1).astype(jnp.float32)
    b2 = b2_t.reshape(-1).astype(jnp.float32)
    H = w1.shape[0]

    if use_pallas is None:
        use_pallas = N >= small_n_threshold
    if not use_pallas:
        # Tiny inputs: fixed pallas_call + reshape cost dominates; a fused XLA
        # elementwise expression wins outright.
        h = jnp.tanh(x[..., None] * w1 + b1)            # (B, E, H)
        return (h * w2).sum(-1) + b2[0]

    # Lane-dense slab: cols a multiple of 128, capped at 1024 so an (8, cols)
    # chunk (plus accumulators/temps) fits in the 64-vreg file, and shrunk for
    # tiny inputs so padding stays modest.
    cols = 128 * max(1, min(cols // 128, 8, pl.cdiv(N, 128)))
    rows = pl.cdiv(N, cols)
    rows_slab = max(rows, 8)        # tiny-input guard: at least one (8, cols) block
    n_slab = rows_slab * cols

    x_flat = x.reshape(-1)
    if n_slab != N:                 # aligned sizes: reshape is a free bitcast
        x_flat = jnp.pad(x_flat, (0, n_slab - N))
    x_slab = x_flat.reshape(rows_slab, cols)

    # Row tile: multiple of 8, never larger than the slab; cap so the parallel
    # grid axis has >= 2 blocks when the slab allows (megacore / v7x 2 TCs).
    tile_rows = max(8, (min(tile_rows, rows_slab) // 8) * 8)
    if rows_slab >= 16:
        half = 8 * pl.cdiv(pl.cdiv(rows_slab, 2), 8)
        tile_rows = min(tile_rows, max(8, half))
    n_blocks = pl.cdiv(rows_slab, tile_rows)   # partial edge block handled by Pallas

    # Single flat parameter vector (3H+1 scalars), prefetched into SMEM.
    params = jnp.concatenate([w1, b1, w2, b2])

    cost = pl.CostEstimate(flops=4 * H * N,
                           transcendentals=H * N,
                           bytes_accessed=8 * N)

    out_slab = pl.pallas_call(
        functools.partial(transforma1d_kernel, bf16_tanh=bf16_tanh),
        out_shape=jax.ShapeDtypeStruct((rows_slab, cols), jnp.float32),
        grid_spec=pltpu.PrefetchScalarGridSpec(
            num_scalar_prefetch=1,
            grid=(n_blocks,),
            in_specs=[pl.BlockSpec((tile_rows, cols), lambda i, p: (i, 0))],
            out_specs=pl.BlockSpec((tile_rows, cols), lambda i, p: (i, 0)),
        ),
        compiler_params=pltpu.CompilerParams(
            dimension_semantics=("parallel",),
        ),
        cost_estimate=cost,
    )(params, x_slab)

    out_flat = out_slab.reshape(-1)
    if n_slab != N:
        out_flat = out_flat[:N]
    return out_flat.reshape(B, E)


def transforma1d_ref(x, w1_t, b1_t, w2_t, b2_t):
    # Pure-JAX reference mirroring the PyTorch forward column by column.
    cols_out = []
    for e in range(x.shape[1]):
        xe = x[:, e:e + 1]                                # (B, 1)
        h = jnp.tanh(xe @ w1_t.T + b1_t[None, :])         # (B, H)
        cols_out.append(h @ w2_t.T + b2_t[None, :])       # (B, 1)
    return jnp.concatenate(cols_out, axis=1)


if __name__ == "__main__":
    # casas.trn (Boston-housing-style data) -> numentradas = 13 input features.
    batch = 8
    numentradas = 13
    numinter = 16

    key = jax.random.PRNGKey(0)
    k1, k2, k3, k4, kx, kx2 = jax.random.split(key, 6)

    # Deterministic parameters, PyTorch-style uniform init.
    w1_t = jax.random.uniform(k1, (numinter, 1), jnp.float32, -1.0, 1.0)
    b1_t = jax.random.uniform(k2, (numinter,), jnp.float32, -1.0, 1.0)
    bnd = 1.0 / (numinter ** 0.5)
    w2_t = jax.random.uniform(k3, (1, numinter), jnp.float32, -bnd, bnd)
    b2_t = jax.random.uniform(k4, (1,), jnp.float32, -bnd, bnd)

    # Small case (matches the PyTorch module's usage), forced through the
    # Pallas kernel: tiny-slab + single-block path.
    x = jax.random.normal(kx, (batch, numentradas), jnp.float32)
    ref = transforma1d_ref(x, w1_t, b1_t, w2_t, b2_t)
    out = jax.block_until_ready(
        transforma1d(x, w1_t, b1_t, w2_t, b2_t, use_pallas=True))
    assert out.shape == (batch, numentradas)
    assert jnp.allclose(out, ref, atol=1e-5, rtol=1e-5)

    # Ragged larger case with small tiles: multi-block grid whose last block is
    # a partial edge block handled by Pallas (no wrapper-side row padding).
    x2 = jax.random.normal(kx2, (300, numentradas), jnp.float32)
    ref2 = transforma1d_ref(x2, w1_t, b1_t, w2_t, b2_t)
    out2 = jax.block_until_ready(
        transforma1d(x2, w1_t, b1_t, w2_t, b2_t,
                     cols=128, tile_rows=16, use_pallas=True))
    assert out2.shape == (300, numentradas)
    assert jnp.allclose(out2, ref2, atol=1e-5, rtol=1e-5)

    # Default dispatch for tiny N takes the fused-XLA fast path.
    out3 = jax.block_until_ready(transforma1d(x, w1_t, b1_t, w2_t, b2_t))
    assert jnp.allclose(out3, ref, atol=1e-5, rtol=1e-5)

    # Opt-in bf16 tanh (EUP lever on v6e/v7x); looser tolerance.
    out4 = jax.block_until_ready(
        transforma1d(x, w1_t, b1_t, w2_t, b2_t, use_pallas=True, bf16_tanh=True))
    assert jnp.allclose(out4, ref, atol=1e-1, rtol=1e-1)

    print("KERNEL_OK")
</pallas_src>

<mosaic_0001>
module attributes {stable_mosaic.version = 11 : i64} {
  func.func @transforma1d_kernel(%arg0: i32, %arg1: memref<49xf32, #tpu.memory_space<smem>>, %arg2: memref<8x128xf32, #tpu.memory_space<vmem>>, %arg3: memref<8x128xf32, #tpu.memory_space<vmem>>) attributes {dimension_semantics = [#tpu.dimension_semantics<parallel>], iteration_bounds = array<i64: 1>, scalar_prefetch = 1 : i64, scratch_operands = 0 : i64, tpu.core_type = #tpu.core_type<tc>, window_params = [{transform_indices = @transform_0, window_bounds = array<i64: 8, 128>}, {transform_indices = @transform_1, window_bounds = array<i64: 8, 128>}]} {
    %c0 = arith.constant 0 : index
    %0 = memref.load %arg1[%c0] : memref<49xf32, #tpu.memory_space<smem>>
    %c1 = arith.constant 1 : index
    %1 = memref.load %arg1[%c1] : memref<49xf32, #tpu.memory_space<smem>>
    %c2 = arith.constant 2 : index
    %2 = memref.load %arg1[%c2] : memref<49xf32, #tpu.memory_space<smem>>
    %c3 = arith.constant 3 : index
    %3 = memref.load %arg1[%c3] : memref<49xf32, #tpu.memory_space<smem>>
    %c4 = arith.constant 4 : index
    %4 = memref.load %arg1[%c4] : memref<49xf32, #tpu.memory_space<smem>>
    %c5 = arith.constant 5 : index
    %5 = memref.load %arg1[%c5] : memref<49xf32, #tpu.memory_space<smem>>
    %c6 = arith.constant 6 : index
    %6 = memref.load %arg1[%c6] : memref<49xf32, #tpu.memory_space<smem>>
    %c7 = arith.constant 7 : index
    %7 = memref.load %arg1[%c7] : memref<49xf32, #tpu.memory_space<smem>>
    %c8 = arith.constant 8 : index
    %8 = memref.load %arg1[%c8] : memref<49xf32, #tpu.memory_space<smem>>
    %c9 = arith.constant 9 : index
    %9 = memref.load %arg1[%c9] : memref<49xf32, #tpu.memory_space<smem>>
    %c10 = arith.constant 10 : index
    %10 = memref.load %arg1[%c10] : memref<49xf32, #tpu.memory_space<smem>>
    %c11 = arith.constant 11 : index
    %11 = memref.load %arg1[%c11] : memref<49xf32, #tpu.memory_space<smem>>
    %c12 = arith.constant 12 : index
    %12 = memref.load %arg1[%c12] : memref<49xf32, #tpu.memory_space<smem>>
    %c13 = arith.constant 13 : index
    %13 = memref.load %arg1[%c13] : memref<49xf32, #tpu.memory_space<smem>>
    %c14 = arith.constant 14 : index
    %14 = memref.load %arg1[%c14] : memref<49xf32, #tpu.memory_space<smem>>
    %c15 = arith.constant 15 : index
    %15 = memref.load %arg1[%c15] : memref<49xf32, #tpu.memory_space<smem>>
    %c16 = arith.constant 16 : index
    %16 = memref.load %arg1[%c16] : memref<49xf32, #tpu.memory_space<smem>>
    %c17 = arith.constant 17 : index
    %17 = memref.load %arg1[%c17] : memref<49xf32, #tpu.memory_space<smem>>
    %c18 = arith.constant 18 : index
    %18 = memref.load %arg1[%c18] : memref<49xf32, #tpu.memory_space<smem>>
    %c19 = arith.constant 19 : index
    %19 = memref.load %arg1[%c19] : memref<49xf32, #tpu.memory_space<smem>>
    %c20 = arith.constant 20 : index
    %20 = memref.load %arg1[%c20] : memref<49xf32, #tpu.memory_space<smem>>
    %c21 = arith.constant 21 : index
    %21 = memref.load %arg1[%c21] : memref<49xf32, #tpu.memory_space<smem>>
    %c22 = arith.constant 22 : index
    %22 = memref.load %arg1[%c22] : memref<49xf32, #tpu.memory_space<smem>>
    %c23 = arith.constant 23 : index
    %23 = memref.load %arg1[%c23] : memref<49xf32, #tpu.memory_space<smem>>
    %c24 = arith.constant 24 : index
    %24 = memref.load %arg1[%c24] : memref<49xf32, #tpu.memory_space<smem>>
    %c25 = arith.constant 25 : index
    %25 = memref.load %arg1[%c25] : memref<49xf32, #tpu.memory_space<smem>>
    %c26 = arith.constant 26 : index
    %26 = memref.load %arg1[%c26] : memref<49xf32, #tpu.memory_space<smem>>
    %c27 = arith.constant 27 : index
    %27 = memref.load %arg1[%c27] : memref<49xf32, #tpu.memory_space<smem>>
    %c28 = arith.constant 28 : index
    %28 = memref.load %arg1[%c28] : memref<49xf32, #tpu.memory_space<smem>>
    %c29 = arith.constant 29 : index
    %29 = memref.load %arg1[%c29] : memref<49xf32, #tpu.memory_space<smem>>
    %c30 = arith.constant 30 : index
    %30 = memref.load %arg1[%c30] : memref<49xf32, #tpu.memory_space<smem>>
    %c31 = arith.constant 31 : index
    %31 = memref.load %arg1[%c31] : memref<49xf32, #tpu.memory_space<smem>>
    %c32 = arith.constant 32 : index
    %32 = memref.load %arg1[%c32] : memref<49xf32, #tpu.memory_space<smem>>
    %c33 = arith.constant 33 : index
    %33 = memref.load %arg1[%c33] : memref<49xf32, #tpu.memory_space<smem>>
    %c34 = arith.constant 34 : index
    %34 = memref.load %arg1[%c34] : memref<49xf32, #tpu.memory_space<smem>>
    %c35 = arith.constant 35 : index
    %35 = memref.load %arg1[%c35] : memref<49xf32, #tpu.memory_space<smem>>
    %c36 = arith.constant 36 : index
    %36 = memref.load %arg1[%c36] : memref<49xf32, #tpu.memory_space<smem>>
    %c37 = arith.constant 37 : index
    %37 = memref.load %arg1[%c37] : memref<49xf32, #tpu.memory_space<smem>>
    %c38 = arith.constant 38 : index
    %38 = memref.load %arg1[%c38] : memref<49xf32, #tpu.memory_space<smem>>
    %c39 = arith.constant 39 : index
    %39 = memref.load %arg1[%c39] : memref<49xf32, #tpu.memory_space<smem>>
    %c40 = arith.constant 40 : index
    %40 = memref.load %arg1[%c40] : memref<49xf32, #tpu.memory_space<smem>>
    %c41 = arith.constant 41 : index
    %41 = memref.load %arg1[%c41] : memref<49xf32, #tpu.memory_space<smem>>
    %c42 = arith.constant 42 : index
    %42 = memref.load %arg1[%c42] : memref<49xf32, #tpu.memory_space<smem>>
    %c43 = arith.constant 43 : index
    %43 = memref.load %arg1[%c43] : memref<49xf32, #tpu.memory_space<smem>>
    %c44 = arith.constant 44 : index
    %44 = memref.load %arg1[%c44] : memref<49xf32, #tpu.memory_space<smem>>
    %c45 = arith.constant 45 : index
    %45 = memref.load %arg1[%c45] : memref<49xf32, #tpu.memory_space<smem>>
    %c46 = arith.constant 46 : index
    %46 = memref.load %arg1[%c46] : memref<49xf32, #tpu.memory_space<smem>>
    %c47 = arith.constant 47 : index
    %47 = memref.load %arg1[%c47] : memref<49xf32, #tpu.memory_space<smem>>
    %c48 = arith.constant 48 : index
    %48 = memref.load %arg1[%c48] : memref<49xf32, #tpu.memory_space<smem>>
    %c0_i32 = arith.constant 0 : i32
    %c8_i32 = arith.constant 8 : i32
    %49 = arith.muli %c0_i32, %c8_i32 : i32
    %50 = tpu.assume_multiple %49, 8 : i32
    %51 = arith.index_cast %50 : i32 to index
    %c0_0 = arith.constant 0 : index
    %52 = vector.load %arg2[%51, %c0_0] : memref<8x128xf32, #tpu.memory_space<vmem>>, vector<8x128xf32>
    %53 = vector.broadcast %0 : f32 to vector<8x128xf32>
    %54 = arith.mulf %53, %52 : vector<8x128xf32>
    %55 = vector.broadcast %16 : f32 to vector<8x128xf32>
    %56 = arith.addf %54, %55 : vector<8x128xf32>
    %57 = math.tanh %56 : vector<8x128xf32>
    %58 = vector.broadcast %32 : f32 to vector<8x128xf32>
    %59 = arith.mulf %58, %57 : vector<8x128xf32>
    %60 = vector.broadcast %48 : f32 to vector<8x128xf32>
    %61 = arith.addf %59, %60 : vector<8x128xf32>
    %62 = vector.broadcast %1 : f32 to vector<8x128xf32>
    %63 = arith.mulf %62, %52 : vector<8x128xf32>
    %64 = vector.broadcast %17 : f32 to vector<8x128xf32>
    %65 = arith.addf %63, %64 : vector<8x128xf32>
    %66 = math.tanh %65 : vector<8x128xf32>
    %67 = vector.broadcast %33 : f32 to vector<8x128xf32>
    %68 = arith.mulf %67, %66 : vector<8x128xf32>
    %69 = vector.broadcast %2 : f32 to vector<8x128xf32>
    %70 = arith.mulf %69, %52 : vector<8x128xf32>
    %71 = vector.broadcast %18 : f32 to vector<8x128xf32>
    %72 = arith.addf %70, %71 : vector<8x128xf32>
    %73 = math.tanh %72 : vector<8x128xf32>
    %74 = vector.broadcast %34 : f32 to vector<8x128xf32>
    %75 = arith.mulf %74, %73 : vector<8x128xf32>
    %76 = arith.addf %61, %75 : vector<8x128xf32>
    %77 = vector.broadcast %4 : f32 to vector<8x128xf32>
    %78 = arith.mulf %77, %52 : vector<8x128xf32>
    %79 = vector.broadcast %20 : f32 to vector<8x128xf32>
    %80 = arith.addf %78, %79 : vector<8x128xf32>
    %81 = math.tanh %80 : vector<8x128xf32>
    %82 = vector.broadcast %36 : f32 to vector<8x128xf32>
    %83 = arith.mulf %82, %81 : vector<8x128xf32>
    %84 = arith.addf %76, %83 : vector<8x128xf32>
    %85 = vector.broadcast %6 : f32 to vector<8x128xf32>
    %86 = arith.mulf %85, %52 : vector<8x128xf32>
    %87 = vector.broadcast %22 : f32 to vector<8x128xf32>
    %88 = arith.addf %86, %87 : vector<8x128xf32>
    %89 = math.tanh %88 : vector<8x128xf32>
    %90 = vector.broadcast %38 : f32 to vector<8x128xf32>
    %91 = arith.mulf %90, %89 : vector<8x128xf32>
    %92 = arith.addf %84, %91 : vector<8x128xf32>
    %93 = vector.broadcast %8 : f32 to vector<8x128xf32>
    %94 = arith.mulf %93, %52 : vector<8x128xf32>
    %95 = vector.broadcast %24 : f32 to vector<8x128xf32>
    %96 = arith.addf %94, %95 : vector<8x128xf32>
    %97 = math.tanh %96 : vector<8x128xf32>
    %98 = vector.broadcast %40 : f32 to vector<8x128xf32>
    %99 = arith.mulf %98, %97 : vector<8x128xf32>
    %100 = arith.addf %92, %99 : vector<8x128xf32>
    %101 = vector.broadcast %10 : f32 to vector<8x128xf32>
    %102 = arith.mulf %101, %52 : vector<8x128xf32>
    %103 = vector.broadcast %26 : f32 to vector<8x128xf32>
    %104 = arith.addf %102, %103 : vector<8x128xf32>
    %105 = math.tanh %104 : vector<8x128xf32>
    %106 = vector.broadcast %42 : f32 to vector<8x128xf32>
    %107 = arith.mulf %106, %105 : vector<8x128xf32>
    %108 = arith.addf %100, %107 : vector<8x128xf32>
    %109 = vector.broadcast %12 : f32 to vector<8x128xf32>
    %110 = arith.mulf %109, %52 : vector<8x128xf32>
    %111 = vector.broadcast %28 : f32 to vector<8x128xf32>
    %112 = arith.addf %110, %111 : vector<8x128xf32>
    %113 = math.tanh %112 : vector<8x128xf32>
    %114 = vector.broadcast %44 : f32 to vector<8x128xf32>
    %115 = arith.mulf %114, %113 : vector<8x128xf32>
    %116 = arith.addf %108, %115 : vector<8x128xf32>
    %117 = vector.broadcast %14 : f32 to vector<8x128xf32>
    %118 = arith.mulf %117, %52 : vector<8x128xf32>
    %119 = vector.broadcast %30 : f32 to vector<8x128xf32>
    %120 = arith.addf %118, %119 : vector<8x128xf32>
    %121 = math.tanh %120 : vector<8x128xf32>
    %122 = vector.broadcast %46 : f32 to vector<8x128xf32>
    %123 = arith.mulf %122, %121 : vector<8x128xf32>
    %124 = arith.addf %116, %123 : vector<8x128xf32>
    %125 = vector.broadcast %3 : f32 to vector<8x128xf32>
    %126 = arith.mulf %125, %52 : vector<8x128xf32>
    %127 = vector.broadcast %19 : f32 to vector<8x128xf32>
    %128 = arith.addf %126, %127 : vector<8x128xf32>
    %129 = math.tanh %128 : vector<8x128xf32>
    %130 = vector.broadcast %35 : f32 to vector<8x128xf32>
    %131 = arith.mulf %130, %129 : vector<8x128xf32>
    %132 = arith.addf %68, %131 : vector<8x128xf32>
    %133 = vector.broadcast %5 : f32 to vector<8x128xf32>
    %134 = arith.mulf %133, %52 : vector<8x128xf32>
    %135 = vector.broadcast %21 : f32 to vector<8x128xf32>
    %136 = arith.addf %134, %135 : vector<8x128xf32>
    %137 = math.tanh %136 : vector<8x128xf32>
    %138 = vector.broadcast %37 : f32 to vector<8x128xf32>
    %139 = arith.mulf %138, %137 : vector<8x128xf32>
    %140 = arith.addf %132, %139 : vector<8x128xf32>
    %141 = vector.broadcast %7 : f32 to vector<8x128xf32>
    %142 = arith.mulf %141, %52 : vector<8x128xf32>
    %143 = vector.broadcast %23 : f32 to vector<8x128xf32>
    %144 = arith.addf %142, %143 : vector<8x128xf32>
    %145 = math.tanh %144 : vector<8x128xf32>
    %146 = vector.broadcast %39 : f32 to vector<8x128xf32>
    %147 = arith.mulf %146, %145 : vector<8x128xf32>
    %148 = arith.addf %140, %147 : vector<8x128xf32>
    %149 = vector.broadcast %9 : f32 to vector<8x128xf32>
    %150 = arith.mulf %149, %52 : vector<8x128xf32>
    %151 = vector.broadcast %25 : f32 to vector<8x128xf32>
    %152 = arith.addf %150, %151 : vector<8x128xf32>
    %153 = math.tanh %152 : vector<8x128xf32>
    %154 = vector.broadcast %41 : f32 to vector<8x128xf32>
    %155 = arith.mulf %154, %153 : vector<8x128xf32>
    %156 = arith.addf %148, %155 : vector<8x128xf32>
    %157 = vector.broadcast %11 : f32 to vector<8x128xf32>
    %158 = arith.mulf %157, %52 : vector<8x128xf32>
    %159 = vector.broadcast %27 : f32 to vector<8x128xf32>
    %160 = arith.addf %158, %159 : vector<8x128xf32>
    %161 = math.tanh %160 : vector<8x128xf32>
    %162 = vector.broadcast %43 : f32 to vector<8x128xf32>
    %163 = arith.mulf %162, %161 : vector<8x128xf32>
    %164 = arith.addf %156, %163 : vector<8x128xf32>
    %165 = vector.broadcast %13 : f32 to vector<8x128xf32>
    %166 = arith.mulf %165, %52 : vector<8x128xf32>
    %167 = vector.broadcast %29 : f32 to vector<8x128xf32>
    %168 = arith.addf %166, %167 : vector<8x128xf32>
    %169 = math.tanh %168 : vector<8x128xf32>
    %170 = vector.broadcast %45 : f32 to vector<8x128xf32>
    %171 = arith.mulf %170, %169 : vector<8x128xf32>
    %172 = arith.addf %164, %171 : vector<8x128xf32>
    %173 = vector.broadcast %15 : f32 to vector<8x128xf32>
    %174 = arith.mulf %173, %52 : vector<8x128xf32>
    %175 = vector.broadcast %31 : f32 to vector<8x128xf32>
    %176 = arith.addf %174, %175 : vector<8x128xf32>
    %177 = math.tanh %176 : vector<8x128xf32>
    %178 = vector.broadcast %47 : f32 to vector<8x128xf32>
    %179 = arith.mulf %178, %177 : vector<8x128xf32>
    %180 = arith.addf %172, %179 : vector<8x128xf32>
    %181 = arith.addf %124, %180 : vector<8x128xf32>
    %182 = arith.index_cast %50 : i32 to index
    %c0_1 = arith.constant 0 : index
    %183 = vector.load %arg3[%182, %c0_1] : memref<8x128xf32, #tpu.memory_space<vmem>>, vector<8x128xf32>
    tpu.vector_store %arg3[%182, %c0_1], %181 {strides = array<i32>} : memref<8x128xf32, #tpu.memory_space<vmem>>, vector<8x128xf32>,
    %c1_i32 = arith.constant 1 : i32
    return
  }
  func.func @transform_0(%arg0: i32, %arg1: memref<49xf32, #tpu.memory_space<smem>>) -> (i32, i32) {
    %c0_i32 = arith.constant 0 : i32
    %c0_i32_0 = arith.constant 0 : i32
    return %arg0, %c0_i32 : i32, i32
  }
  func.func @transform_1(%arg0: i32, %arg1: memref<49xf32, #tpu.memory_space<smem>>) -> (i32, i32) {
    %c0_i32 = arith.constant 0 : i32
    %c0_i32_0 = arith.constant 0 : i32
    return %arg0, %c0_i32 : i32, i32
  }
}

</mosaic_0001>

<bundles_post_ra>
// kernel: tpu_custom_call.1
= control target key start
LH: loop header
LB: loop body
LE: loop exit
PB: predicated region body
PF: predicated region fallthrough
CT: control target
= control target key end

     0   :  { %s577_s0 = inlined_call_operand.hbm [shape: f32[49], index: 0, kind: input, shape index: {}]   ;;  %s578_s1 = inlined_call_operand.hbm [shape: f32[8,128], index: 1, kind: input, shape index: {}]   ;;  %s579_s2 = inlined_call_operand.hbm [shape: f32[8,128], index: 2, kind: output, shape index: {}]  }
   0x1   :  { %s304_s11 = scalar_lea.hbm %s577_s0, 16 }
   0x2   :  { %p305_p0 = scmp.ne.s32.totalorder %s577_s0, %s304_s11  ;;  %p308_p1 = scmp.lt.u32.totalorder %s304_s11, %s577_s0 }
   0x4   :  { %p310_p2 = pnand %p308_p1, %p305_p0 }
   0x6   :  { %313 = shalt.err (!%p310_p2)  }
   0x7   :  { %s364_s16 = smov [#allocation3]  }
   0x8   :  { %8 = dma.hbm_to_smem %s577_s0, 16, %s364_s16, [#allocation2] }
   0x9   :  { %358 = dma.done.wait [#allocation2], 16 }
   0xa   :  { %359 = vsyncadd [#allocation2], 4294967280 }
   0xb   :  { %10 = sfence }
   0xc   :  { %11 = vsyncpa [#allocation5], 0 }
   0xd   :  { %12 = vsyncpa [#allocation6], 0  ;;  %s365_s19 = smov [#allocation4]   ;;  %s314_s23 = scalar_lea.hbm %s578_s1, 128 }
   0xe   :  { %s19_s20 = sshll.u32 %s365_s19, 4  ;;  %p315_p3 = scmp.ne.s32.totalorder %s578_s1, %s314_s23  ;;  %s20_s20 = int_to_ptr.vmem [resolvable:$true] %s19_s20 }
   0xf   :  { %p318_p4 = scmp.lt.u32.totalorder %s314_s23, %s578_s1 }
  0x11   :  { %p320_p5 = pnand %p318_p4, %p315_p3 }
  0x13   :  { %323 = shalt.err (!%p320_p5)
}
  0x14   :  { %s324_s0 = scalar_lea.vmem %s20_s20, 128  ;;  %p329_p7 = scmp.lt.s32.totalorder %s20_s20, %s20_s20 }
  0x15   :  { %p325_p6 = scmp.ne.s32.totalorder %s20_s20, %s324_s0  ;;  %p330_p8 = scmp.lt.s32.totalorder %s324_s0, %s324_s0 }
  0x17   :  { %p331_p9 = por %p330_p8, %p329_p7 }
  0x19   :  { %p332_p10 = pnand %p331_p9, %p325_p6 }
  0x1b   :  { %335 = shalt.err (!%p332_p10)
}
  0x1c   :  { %22 = dma.hbm_to_vmem [thread:$0]  %s578_s1, 128, %s20_s20, [#allocation5]  }
  0x1d   :  { %360 = dma.done.wait [#allocation5], 128  }
  0x1e   :  { %361 = vsyncadd [#allocation5], 4294967168  ;;  %s26_s30 = sld [smem:[#allocation3]]  ;;  %s221_s3 = sld [smem:[#allocation3 + $0x1]]  ;;  %v432_v0 = vld [vmem:[#allocation4] sm:$0xff] }
  0x1f   :  { %s406_s4 = sld [smem:[#allocation3 + $0x2]]  ;;  %s408_s5 = sld [smem:[#allocation3 + $0x3]] }
  0x20   :  { %s410_s6 = sld [smem:[#allocation3 + $0x4]]  ;;  %s412_s7 = sld [smem:[#allocation3 + $0x5]] }
  0x21   :  { %s414_s8 = sld [smem:[#allocation3 + $0x6]]  ;;  %s416_s9 = sld [smem:[#allocation3 + $0x7]] }
  0x22   :  { %s418_s1 = sld [smem:[#allocation3 + $0x8]]  ;;  %s420_s10 = sld [smem:[#allocation3 + $0x9]] }
  0x23   :  { %s422_s11 = sld [smem:[#allocation3 + $0xa]]  ;;  %s424_s12 = sld [smem:[#allocation3 + $0xc]] }
  0x24   :  { %s426_s13 = sld [smem:[#allocation3 + $0xb]]  ;;  %s428_s14 = sld [smem:[#allocation3 + $0x10]]  ;;  %v76_v1 = vstv %s26_s30  ;;  %v85_v2 = vstv %s221_s3 }
  0x25   :  { %s430_s15 = sld [smem:[#allocation3 + $0x11]]  ;;  %s434_s16 = sld [smem:[#allocation3 + $0xd]]  ;;  %v92_v3 = vstv %s406_s4  ;;  %v148_v5 = vstv %s408_s5  ;;  %v77_v9 = vmul.f32 %v76_v1, %v432_v0  ;;  %v86_v10 = vmul.f32 %v85_v2, %v432_v0 }
  0x26   :  { %s436_s17 = sld [smem:[#allocation3 + $0x12]]  ;;  %v100_v4 = vstv %s410_s6  ;;  %s441_s18 = sld [smem:[#allocation3 + $0xe]]  ;;  %v156_v7 = vstv %s412_s7  ;;  %v93_v12 = vmul.f32 %v92_v3, %v432_v0  ;;  %v149_v14 = vmul.f32 %v148_v5, %v432_v0 }
  0x27   :  { %s443_s19 = sld [smem:[#allocation3 + $0x14]]  ;;  %v108_v6 = vstv %s414_s8  ;;  %v164_v8 = vstv %s416_s9  ;;  %s448_s20 = sld [smem:[#allocation3 + $0x13]]  ;;  %v101_v13 = vmul.f32 %v100_v4, %v432_v0  ;;  %v157_v18 = vmul.f32 %v156_v7, %v432_v0 }
  0x28   :  { %s450_s21 = sld [smem:[#allocation3 + $0x16]]  ;;  %v116_v11 = vstv %s418_s1  ;;  %s455_s22 = sld [smem:[#allocation3 + $0x15]]  ;;  %v172_v15 = vstv %s420_s10  ;;  %v109_v16 = vmul.f32 %v108_v6, %v432_v0  ;;  %v165_v19 = vmul.f32 %v164_v8, %v432_v0 }
  0x29   :  { %s457_s23 = sld [smem:[#allocation3 + $0x18]]  ;;  %s463_s24 = sld [smem:[#allocation3 + $0x17]]  ;;  %v124_v17 = vstv %s422_s11  ;;  %v117_v22 = vmul.f32 %v116_v11, %v432_v0  ;;  %v132_v23 = vstv %s424_s12  ;;  %v173_v27 = vmul.f32 %v172_v15, %v432_v0 }
  0x2a   :  { %s465_s25 = sld [smem:[#allocation3 + $0x1a]]  ;;  %s471_s26 = sld [smem:[#allocation3 + $0x19]]  ;;  %v78_v20 = vstv %s428_s14  ;;  %v125_v30 = vmul.f32 %v124_v17, %v432_v0  ;;  %v180_v31 = vstv %s426_s13  ;;  %v133_v34 = vmul.f32 %v132_v23, %v432_v0 }
  0x2b   :  { %s473_s27 = sld [smem:[#allocation3 + $0x1c]]  ;;  %v87_v21 = vstv %s430_s15  ;;  %s479_s0 = sld [smem:[#allocation3 + $0xf]]  ;;  %v79_v24 = vadd.f32 %v78_v20, %v77_v9  ;;  %v188_v46 = vstv %s434_s16  ;;  %v181_v49 = vmul.f32 %v180_v31, %v432_v0 }
  0x2c   :  { %s481_s28 = sld [smem:[#allocation3 + $0x1b]]  ;;  %v88_v25 = vadd.f32 %v87_v21, %v86_v10  ;;  %v94_v26 = vstv %s436_s17  ;;  %s485_s29 = sld [smem:[#allocation3 + $0x1e]]  ;;  %v140_v37 = vstv %s441_s18  ;;  %v189_v56 = vmul.f32 %v188_v46, %v432_v0 }
  0x2d   :  { %v95_v28 = vadd.f32 %v94_v26, %v93_v12  ;;  %v102_v29 = vstv %s443_s19  ;;  %s490_s30 = sld [smem:[#allocation3 + $0x1d]]  ;;  %s492_s3 = sld [smem:[#allocation3 + $0x20]]  ;;  %272 = vtanh.f32 %v79_v24  ;;  %v150_v40 = vstv %s448_s20 }
  0x2e   :  { %v103_v32 = vadd.f32 %v102_v29, %v101_v13  ;;  %v110_v33 = vstv %s450_s21  ;;  %274 = vtanh.f32 %v88_v25  ;;  %s498_s4 = sld [smem:[#allocation3 + $0x1f]]  ;;  %s500_s5 = sld [smem:[#allocation3 + $0x22]]  ;;  %v158_v43 = vstv %s455_s22 }
  0x2f   :  { %v111_v35 = vadd.f32 %v110_v33, %v109_v16  ;;  %v118_v36 = vstv %s457_s23  ;;  %276 = vtanh.f32 %v95_v28  ;;  %s504_s6 = sld [smem:[#allocation3 + $0x24]]  ;;  %s508_s7 = sld [smem:[#allocation3 + $0x26]]  ;;  %v166_v45 = vstv %s463_s24 }
  0x30   :  { %v119_v38 = vadd.f32 %v118_v36, %v117_v22  ;;  %v126_v39 = vstv %s465_s25  ;;  %278 = vtanh.f32 %v103_v32  ;;  %v151_v47 = vadd.f32 %v150_v40, %v149_v14  ;;  %s514_s8 = sld [smem:[#allocation3 + $0x21]]  ;;  %s519_s9 = sld [smem:[#allocation3 + $0x28]] }
  0x31   :  { %v127_v41 = vadd.f32 %v126_v39, %v125_v30  ;;  %v134_v42 = vstv %s473_s27  ;;  %280 = vtanh.f32 %v111_v35  ;;  %v174_v48 = vstv %s471_s26  ;;  %s521_s1 = sld [smem:[#allocation3 + $0x30]]  ;;  %s527_s10 = sld [smem:[#allocation3 + $0x23]] }
  0x32   :  { %v135_v44 = vadd.f32 %v134_v42, %v133_v34  ;;  %282 = vtanh.f32 %v119_v38  ;;  %v141_v50 = vmul.f32 %v140_v37, %v432_v0  ;;  %v159_v51 = vadd.f32 %v158_v43, %v157_v18  ;;  %s529_s11 = sld [smem:[#allocation3 + $0x2a]]  ;;  %s532_s12 = sld [smem:[#allocation3 + $0x25]] }
  0x33   :  { %v182_v52 = vstv %s481_s28  ;;  %v196_v53 = vstv %s479_s0  ;;  %284 = vtanh.f32 %v127_v41  ;;  %v142_v54 = vstv %s485_s29  ;;  %s536_s13 = sld [smem:[#allocation3 + $0x27]]  ;;  %s540_s14 = sld [smem:[#allocation3 + $0x29]] }
  0x34   :  { %v167_v55 = vadd.f32 %v166_v45, %v165_v19  ;;  %v81_v57 = vstv %s492_s3  ;;  %286 = vtanh.f32 %v135_v44  ;;  %v175_v58 = vadd.f32 %v174_v48, %v173_v27  ;;  %s542_s15 = sld [smem:[#allocation3 + $0x2c]]  ;;  %s545_s16 = sld [smem:[#allocation3 + $0x2b]] }
  0x35   :  { %v190_v59 = vstv %s490_s30  ;;  %288 = vtanh.f32 %v151_v47  ;;  %v183_v60 = vadd.f32 %v182_v52, %v181_v49  ;;  %v197_v61 = vmul.f32 %v196_v53, %v432_v0  ;;  %s549_s17 = sld [smem:[#allocation3 + $0x2d]]  ;;  %s551_s18 = sld [smem:[#allocation3 + $0x2e]] }
  0x36   :  { %v97_v63 = vstv %s500_s5  ;;  %v143_v1 = vadd.f32 %v142_v54, %v141_v50  ;;  %290 = vtanh.f32 %v159_v51  ;;  %v198_v2 = vstv %s498_s4  ;;  %s556_s19 = sld [smem:[#allocation3 + $0x2f]]  ;;  %s366_s20 = smov [#allocation7]  }
  0x37   :  { %v273_v62 = vpop.eup %272  ;;  %v105_v5 = vstv %s504_s6  ;;  %292 = vtanh.f32 %v167_v55  ;;  %v191_v6 = vadd.f32 %v190_v59, %v189_v56  ;;  %v113_v8 = vstv %s508_s7  ;;  %s212_s21 = sshll.u32 %s366_s20, 4  ;;  %s213_s21 = int_to_ptr.vmem [resolvable:$true] %s212_s21 }
  0x38   :  { %v275_v3 = vpop.eup %274  ;;  %v82_v4 = vmul.f32 %v273_v62, %v81_v57  ;;  %294 = vtanh.f32 %v175_v58  ;;  %v83_v9 = vstv %s521_s1  ;;  %v199_v11 = vadd.f32 %v198_v2, %v197_v61  ;;  %s336_s22 = scalar_lea.vmem %s213_s21, 128  ;;  %p341_p12 = scmp.lt.s32.totalorder %s213_s21, %s213_s21 }
  0x39   :  { %v277_v7 = vpop.eup %276  ;;  %296 = vtanh.f32 %v183_v60  ;;  %v90_v16 = vstv %s514_s8  ;;  %v121_v17 = vstv %s519_s9  ;;  %v129_v21 = vstv %s529_s11  ;;  %p337_p11 = scmp.ne.s32.totalorder %s213_s21, %s336_s22  ;;  %p342_p13 = scmp.lt.s32.totalorder %s336_s22, %s336_s22 }
  0x3a   :  { %v279_v0 = vpop.eup %278  ;;  %v98_v10 = vmul.f32 %v277_v7, %v97_v63  ;;  %v84_v13 = vadd.f32 %v83_v9, %v82_v4  ;;  %298 = vtanh.f32 %v143_v1  ;;  %v153_v22 = vstv %s527_s10 }
  0x3b   :  { %v281_v12 = vpop.eup %280  ;;  %v106_v14 = vmul.f32 %v279_v0, %v105_v5  ;;  %300 = vtanh.f32 %v191_v6  ;;  %v91_v24 = vmul.f32 %v275_v3, %v90_v16  ;;  %v161_v27 = vstv %s532_s12  ;;  %p343_p0 = por %p342_p13, %p341_p12 }
  0x3c   :  { %v283_v15 = vpop.eup %282  ;;  %v99_v18 = vadd.f32 %v98_v10, %v84_v13  ;;  %v114_v19 = vmul.f32 %v281_v12, %v113_v8  ;;  %302 = vtanh.f32 %v199_v11  ;;  %v169_v29 = vstv %s536_s13 }
  0x3d   :  { %v285_v20 = vpop.eup %284  ;;  %v122_v26 = vmul.f32 %v283_v15, %v121_v17  ;;  %v137_v35 = vstv %s542_s15  ;;  %v177_v37 = vstv %s540_s14  ;;  %v185_v43 = vstv %s545_s16  ;;  %p344_p1 = pnand %p343_p0, %p337_p11 }
  0x3e   :  { %v287_v23 = vpop.eup %286  ;;  %v107_v25 = vadd.f32 %v106_v14, %v99_v18  ;;  %v130_v32 = vmul.f32 %v285_v20, %v129_v21  ;;  %v145_v50 = vstv %s551_s18  ;;  %v193_v51 = vstv %s549_s17 }
  0x3f   :  { %v289_v28 = vpop.eup %288  ;;  %v138_v46 = vmul.f32 %v287_v23, %v137_v35  ;;  %v201_v55 = vstv %s556_s19 }
  0x40   :  { %v291_v30 = vpop.eup %290  ;;  %v115_v31 = vadd.f32 %v114_v19, %v107_v25  ;;  %v154_v33 = vmul.f32 %v289_v28, %v153_v22 }
  0x41   :  { %v293_v34 = vpop.eup %292  ;;  %v162_v36 = vmul.f32 %v291_v30, %v161_v27 }
  0x42   :  { %v295_v38 = vpop.eup %294  ;;  %v123_v39 = vadd.f32 %v122_v26, %v115_v31  ;;  %v155_v40 = vadd.f32 %v154_v33, %v91_v24  ;;  %v170_v41 = vmul.f32 %v293_v34, %v169_v29 }
  0x43   :  { %v297_v42 = vpop.eup %296  ;;  %v178_v48 = vmul.f32 %v295_v38, %v177_v37 }
  0x44   :  { %v299_v44 = vpop.eup %298  ;;  %v131_v45 = vadd.f32 %v130_v32, %v123_v39  ;;  %v163_v47 = vadd.f32 %v162_v36, %v155_v40  ;;  %v186_v53 = vmul.f32 %v297_v42, %v185_v43 }
  0x45   :  { %v301_v49 = vpop.eup %300  ;;  %v146_v57 = vmul.f32 %v299_v44, %v145_v50 }
  0x46   :  { %v171_v52 = vadd.f32 %v170_v41, %v163_v47  ;;  %v303_v54 = vpop.eup %302  ;;  %v139_v56 = vadd.f32 %v138_v46, %v131_v45  ;;  %v194_v59 = vmul.f32 %v301_v49, %v193_v51 }
  0x47   :  { %v202_v61 = vmul.f32 %v303_v54, %v201_v55 }
  0x48   :  { %v179_v58 = vadd.f32 %v178_v48, %v171_v52  ;;  %v147_v62 = vadd.f32 %v146_v57, %v139_v56 }
  0x4a   :  { %v187_v60 = vadd.f32 %v186_v53, %v179_v58 }
  0x4c   :  { %v195_v63 = vadd.f32 %v194_v59, %v187_v60 }
  0x4e   :  { %v203_v1 = vadd.f32 %v202_v61, %v195_v63 }
  0x50   :  { %v204_v2 = vadd.f32 %v203_v1, %v147_v62 }
  0x52   :  { %205 = vst [vmem:[#allocation7] sm:$0xff] %v204_v2 }
  0x53   :  { %347 = shalt.err (!%p344_p1)
}
  0x54   :  { %s348_s25 = scalar_lea.hbm %s579_s2, 128 }
  0x55   :  { %p349_p2 = scmp.ne.s32.totalorder %s579_s2, %s348_s25  ;;  %p352_p3 = scmp.lt.u32.totalorder %s348_s25, %s579_s2 }
  0x57   :  { %p354_p4 = pnand %p352_p3, %p349_p2 }
  0x59   :  { %357 = shalt.err (!%p354_p4)
}
  0x5a   :  { %215 = dma.vmem_to_hbm [thread:$0]  %s213_s21, 128, %s579_s2, [#allocation6]  }
  0x5b   :  { %362 = dma.done.wait [#allocation6], 128  }
  0x5c   :  { %363 = vsyncadd [#allocation6], 4294967168 }
  0x5d   :  { %219 = vsyncpa [#allocation5], 1 }
  0x5e   :  { %220 = vsyncpa [#allocation6], 1 }

</bundles_post_ra>
